<compile_context>
chip_gen: v7x
topology: tpu7x:2x2x1
jax: 0.10.0
libtpu: 0.0.40
codegen_flags: <defaults>
</compile_context>

<pallas_src>
import functools

import jax
import jax.numpy as jnp
from jax.experimental import pallas as pl
from jax.experimental.pallas import tpu as pltpu

_LANE = 128
_EXP_CLAMP = 80.0  # exp(80) is finite in f32; keeps masked (non-edge) entries finite.


def _round_up(x, m):
    return (x + m - 1) // m * m


def _prologue_kernel(x_ref, w_ref, a_ref, h_ref, f1_ref, f2_ref):
    """Per row-tile: h = x @ W, f1 = sum(h*a1, -1), f2 = sum(h*a2, -1)."""
    x = x_ref[...]                                   # (tq, Fin)  f32
    w = w_ref[...]                                   # (Fin, Fp)  f32
    h = jnp.dot(x, w, preferred_element_type=jnp.float32)   # (tq, Fp) f32
    a = a_ref[...]                                   # (2, Fp)
    f1 = jnp.sum(h * a[0:1, :], axis=1, keepdims=True)      # (tq, 1)
    f2 = jnp.sum(h * a[1:2, :], axis=1, keepdims=True)      # (tq, 1)
    h_ref[...] = h.astype(h_ref.dtype)               # stored bf16 for the MXU pass
    f1_ref[...] = f1
    f2_ref[...] = f2


def _gat_agg_kernel(adj_ref, h_ref, f1_ref, f2t_ref, out_ref,
                    acc_ref, rsum_ref, *, alpha, concat):
    """Flash-style aggregation over column tiles of the (masked) attention matrix."""
    k = pl.program_id(1)

    @pl.when(k == 0)
    def _():
        acc_ref[...] = jnp.zeros_like(acc_ref)
        rsum_ref[...] = jnp.zeros_like(rsum_ref)

    f1 = f1_ref[...]                                 # (tq, 1)
    f2 = f2t_ref[...]                                # (1, tk)
    s = f1 + f2                                      # (tq, tk) broadcast, no transpose
    # -LeakyReLU(s) == min(-s, -alpha*s); clamp so masked entries stay finite (no inf*0).
    z = jnp.minimum(jnp.minimum(-s, (-alpha) * s), _EXP_CLAMP)
    e = jnp.exp(z) * adj_ref[...].astype(jnp.float32)        # (tq, tk), zero off-edge

    rsum_ref[...] += jnp.sum(e, axis=1, keepdims=True)
    acc_ref[...] += jnp.dot(e.astype(jnp.bfloat16), h_ref[...],
                            preferred_element_type=jnp.float32)

    @pl.when(k == pl.num_programs(1) - 1)
    def _():
        hp = acc_ref[...] * pl.reciprocal(rsum_ref[...], approx=True)
        if concat:  # F.elu with default alpha=1
            hp = jnp.where(hp > 0, hp, jnp.exp(hp) - 1.0)
        out_ref[...] = hp.astype(out_ref.dtype)


def sp_graph_attention(x, adj, W, a, *, alpha=0.2, concat=True):
    """Pallas forward of SpGraphAttentionLayer (eval mode)."""
    N, fin = x.shape
    fout = W.shape[1]

    # Lane-dense padded feature width and row/col tiles.
    fp = _round_up(max(fout, _LANE), _LANE)
    tile = min(512, _round_up(N, _LANE))             # tq == tk; fits VMEM on v5e/v6e/v7x
    n_pad = _round_up(N, tile)
    tq = tk = tile

    # Zero-padded operands (XLA-side, one-time).
    x_p = jnp.zeros((n_pad, fin), jnp.float32).at[:N, :].set(x.astype(jnp.float32))
    adj_p = jnp.zeros((n_pad, n_pad), jnp.bfloat16).at[:N, :N].set(adj.astype(jnp.bfloat16))
    w_p = jnp.zeros((fin, fp), jnp.float32).at[:, :fout].set(W.astype(jnp.float32))
    a_p = jnp.zeros((2, fp), jnp.float32)
    a_p = a_p.at[0, :fout].set(a[0, :fout]).at[1, :fout].set(a[0, fout:])

    # --- Prologue: h = x @ W, f1, f2 computed once (tiled over rows). ---
    h, f1, f2 = pl.pallas_call(
        _prologue_kernel,
        out_shape=(jax.ShapeDtypeStruct((n_pad, fp), jnp.bfloat16),
                   jax.ShapeDtypeStruct((n_pad, 1), jnp.float32),
                   jax.ShapeDtypeStruct((n_pad, 1), jnp.float32)),
        grid_spec=pltpu.PrefetchScalarGridSpec(
            num_scalar_prefetch=0,
            grid=(n_pad // tq,),
            in_specs=[pl.BlockSpec((tq, fin), lambda i: (i, 0)),
                      pl.BlockSpec((fin, fp), lambda i: (0, 0)),
                      pl.BlockSpec((2, fp), lambda i: (0, 0))],
            out_specs=[pl.BlockSpec((tq, fp), lambda i: (i, 0)),
                       pl.BlockSpec((tq, 1), lambda i: (i, 0)),
                       pl.BlockSpec((tq, 1), lambda i: (i, 0))]),
        compiler_params=pltpu.CompilerParams(dimension_semantics=("parallel",)),
    )(x_p, w_p, a_p)

    # Hand f2 to the main kernel as a row vector -> no per-tile XLU transpose.
    f2t = f2.reshape(1, n_pad)

    # --- Main pass: tiled masked-softmax-free aggregation with resident accumulators. ---
    kernel = functools.partial(_gat_agg_kernel, alpha=float(alpha), concat=bool(concat))
    out_p = pl.pallas_call(
        kernel,
        out_shape=jax.ShapeDtypeStruct((n_pad, fp), jnp.float32),
        grid_spec=pltpu.PrefetchScalarGridSpec(
            num_scalar_prefetch=0,
            grid=(n_pad // tq, n_pad // tk),          # reduction (column) axis last
            in_specs=[pl.BlockSpec((tq, tk), lambda i, k: (i, k)),   # adj tile
                      pl.BlockSpec((tk, fp), lambda i, k: (k, 0)),   # h_j tile (bf16)
                      pl.BlockSpec((tq, 1), lambda i, k: (i, 0)),    # f1_i
                      pl.BlockSpec((1, tk), lambda i, k: (0, k))],   # f2_j (row vector)
            out_specs=pl.BlockSpec((tq, fp), lambda i, k: (i, 0)),
            scratch_shapes=[pltpu.VMEM((tq, fp), jnp.float32),       # hp accumulator
                            pltpu.VMEM((tq, 1), jnp.float32)]),      # rowsum accumulator
        compiler_params=pltpu.CompilerParams(
            dimension_semantics=("parallel", "arbitrary")),
    )(adj_p, h, f1, f2t)

    # TODO(synk): nn.Dropout on edge_e is identity at inference; not applied here.
    return out_p[:N, :fout]


def _reference(x, adj, W, a, *, alpha=0.2, concat=True):
    """Pure-JAX f32 reference mirroring the PyTorch forward (eval mode)."""
    h = x @ W
    fout = W.shape[1]
    f1 = jnp.sum(h * a[:, :fout], axis=1, keepdims=True)
    f2 = jnp.sum(h * a[:, fout:], axis=1, keepdims=True)
    s = f1 + f2.T
    e = jnp.exp(-jnp.where(s > 0, s, alpha * s))
    e = jnp.where(adj != 0, e, 0.0)
    rowsum = jnp.sum(e, axis=1, keepdims=True)
    hp = (e @ h) / rowsum
    return jnp.where(hp > 0, hp, jnp.exp(hp) - 1.0) if concat else hp


if __name__ == "__main__":
    # Small shapes consistent with the module: N nodes, in_features -> out_features.
    # (Levers above only matter at realistic N >= 1024; this size is a correctness check.)
    N, in_features, out_features = 16, 8, 16
    alpha = 0.2

    key = jax.random.PRNGKey(0)
    k_x, k_adj, k_w, k_a = jax.random.split(key, 4)

    # Deterministic parameter init (xavier_normal_ with gain=1.414, as in __init__).
    std_w = 1.414 * (2.0 / (in_features + out_features)) ** 0.5
    W = std_w * jax.random.normal(k_w, (in_features, out_features), dtype=jnp.float32)
    std_a = 1.414 * (2.0 / (1 + 2 * out_features)) ** 0.5
    a = std_a * jax.random.normal(k_a, (1, 2 * out_features), dtype=jnp.float32)

    # Node features and a dense 0/1 adjacency with self-loops (no empty rows, so the
    # rowsum division never hits zero, matching the module's nan asserts).
    x = jax.random.normal(k_x, (N, in_features), dtype=jnp.float32)
    adj = (jax.random.uniform(k_adj, (N, N)) < 0.3).astype(jnp.float32)
    adj = jnp.maximum(adj, jnp.eye(N, dtype=jnp.float32))

    out = jax.block_until_ready(sp_graph_attention(x, adj, W, a, alpha=alpha, concat=True))

    ref = _reference(x, adj, W, a, alpha=alpha, concat=True)
    assert out.shape == (N, out_features)
    assert bool(jnp.all(jnp.isfinite(out)))
    # Kernel uses bf16 MXU operands + approx reciprocal -> relaxed tolerance vs f32 ref.
    assert bool(jnp.allclose(out, ref, atol=3e-2, rtol=3e-2))

    print("KERNEL_OK")
</pallas_src>

<mosaic_0001>
module attributes {stable_mosaic.version = 11 : i64} {
  func.func @_prologue_kernel(%arg0: i32, %arg1: memref<128x8xf32, #tpu.memory_space<vmem>>, %arg2: memref<8x128xf32, #tpu.memory_space<vmem>>, %arg3: memref<2x128xf32, #tpu.memory_space<vmem>>, %arg4: memref<128x128xbf16, #tpu.memory_space<vmem>>, %arg5: memref<128x1xf32, #tpu.memory_space<vmem>>, %arg6: memref<128x1xf32, #tpu.memory_space<vmem>>) attributes {dimension_semantics = [#tpu.dimension_semantics<parallel>], iteration_bounds = array<i64: 1>, scalar_prefetch = 0 : i64, scratch_operands = 0 : i64, tpu.core_type = #tpu.core_type<tc>, window_params = [{transform_indices = @transform_0, window_bounds = array<i64: 128, 8>}, {pipeline_mode = #tpu.pipeline_mode<synchronous>, transform_indices = @transform_1, window_bounds = array<i64: 8, 128>}, {pipeline_mode = #tpu.pipeline_mode<synchronous>, transform_indices = @transform_2, window_bounds = array<i64: 2, 128>}, {transform_indices = @transform_3, window_bounds = array<i64: 128, 128>}, {transform_indices = @transform_4, window_bounds = array<i64: 128, 1>}, {transform_indices = @transform_5, window_bounds = array<i64: 128, 1>}]} {
    %c0 = arith.constant 0 : index
    %c0_0 = arith.constant 0 : index
    %0 = vector.load %arg1[%c0, %c0_0] : memref<128x8xf32, #tpu.memory_space<vmem>>, vector<128x8xf32>
    %c0_1 = arith.constant 0 : index
    %c0_2 = arith.constant 0 : index
    %1 = vector.load %arg2[%c0_1, %c0_2] : memref<8x128xf32, #tpu.memory_space<vmem>>, vector<8x128xf32>
    %cst = arith.constant dense<0.000000e+00> : vector<128x128xf32>
    %2 = tpu.matmul %0, %1, %cst {dimension_numbers = #tpu.dot_dimension_numbers<[1], [0], [0], [1], [0, 0, 1, 1], [], []>} : vector<128x8xf32>, vector<8x128xf32>, vector<128x128xf32> -> vector<128x128xf32>
    %c0_3 = arith.constant 0 : index
    %c0_4 = arith.constant 0 : index
    %3 = vector.load %arg3[%c0_3, %c0_4] : memref<2x128xf32, #tpu.memory_space<vmem>>, vector<2x128xf32>
    %4 = vector.extract_strided_slice %3 {offsets = [0, 0], sizes = [1, 128], strides = [1, 1]} : vector<2x128xf32> to vector<1x128xf32>
    %5 = vector.broadcast %4 : vector<1x128xf32> to vector<128x128xf32>
    %6 = arith.mulf %2, %5 : vector<128x128xf32>
    %cst_5 = arith.constant dense<0.000000e+00> : vector<128xf32>
    %7 = vector.multi_reduction <add>, %6, %cst_5 [1] : vector<128x128xf32> to vector<128xf32>
    %8 = vector.shape_cast %7 : vector<128xf32> to vector<128x1xf32>
    %9 = vector.extract_strided_slice %3 {offsets = [1, 0], sizes = [1, 128], strides = [1, 1]} : vector<2x128xf32> to vector<1x128xf32>
    %10 = vector.broadcast %9 : vector<1x128xf32> to vector<128x128xf32>
    %11 = arith.mulf %2, %10 : vector<128x128xf32>
    %cst_6 = arith.constant dense<0.000000e+00> : vector<128xf32>
    %12 = vector.multi_reduction <add>, %11, %cst_6 [1] : vector<128x128xf32> to vector<128xf32>
    %13 = vector.shape_cast %12 : vector<128xf32> to vector<128x1xf32>
    %14 = arith.truncf %2 : vector<128x128xf32> to vector<128x128xbf16>
    %c0_7 = arith.constant 0 : index
    %c0_8 = arith.constant 0 : index
    %15 = vector.load %arg4[%c0_7, %c0_8] : memref<128x128xbf16, #tpu.memory_space<vmem>>, vector<128x128xbf16>
    tpu.vector_store %arg4[%c0_7, %c0_8], %14 {strides = array<i32>} : memref<128x128xbf16, #tpu.memory_space<vmem>>, vector<128x128xbf16>,
    %c0_9 = arith.constant 0 : index
    %c0_10 = arith.constant 0 : index
    %16 = vector.load %arg5[%c0_9, %c0_10] : memref<128x1xf32, #tpu.memory_space<vmem>>, vector<128x1xf32>
    tpu.vector_store %arg5[%c0_9, %c0_10], %8 {strides = array<i32>} : memref<128x1xf32, #tpu.memory_space<vmem>>, vector<128x1xf32>,
    %c0_11 = arith.constant 0 : index
    %c0_12 = arith.constant 0 : index
    %17 = vector.load %arg6[%c0_11, %c0_12] : memref<128x1xf32, #tpu.memory_space<vmem>>, vector<128x1xf32>
    tpu.vector_store %arg6[%c0_11, %c0_12], %13 {strides = array<i32>} : memref<128x1xf32, #tpu.memory_space<vmem>>, vector<128x1xf32>,
    return
  }
  func.func @transform_0(%arg0: i32) -> (i32, i32) {
    %c0_i32 = arith.constant 0 : i32
    %c0_i32_0 = arith.constant 0 : i32
    return %arg0, %c0_i32 : i32, i32
  }
  func.func @transform_1(%arg0: i32) -> (i32, i32) {
    %c0_i32 = arith.constant 0 : i32
    %c0_i32_0 = arith.constant 0 : i32
    %c0_i32_1 = arith.constant 0 : i32
    return %c0_i32, %c0_i32_0 : i32, i32
  }
  func.func @transform_2(%arg0: i32) -> (i32, i32) {
    %c0_i32 = arith.constant 0 : i32
    %c0_i32_0 = arith.constant 0 : i32
    %c0_i32_1 = arith.constant 0 : i32
    return %c0_i32, %c0_i32_0 : i32, i32
  }
  func.func @transform_3(%arg0: i32) -> (i32, i32) {
    %c0_i32 = arith.constant 0 : i32
    %c0_i32_0 = arith.constant 0 : i32
    return %arg0, %c0_i32 : i32, i32
  }
  func.func @transform_4(%arg0: i32) -> (i32, i32) {
    %c0_i32 = arith.constant 0 : i32
    %c0_i32_0 = arith.constant 0 : i32
    return %arg0, %c0_i32 : i32, i32
  }
  func.func @transform_5(%arg0: i32) -> (i32, i32) {
    %c0_i32 = arith.constant 0 : i32
    %c0_i32_0 = arith.constant 0 : i32
    return %arg0, %c0_i32 : i32, i32
  }
}

</mosaic_0001>

<bundles_post_ra>
// kernel: tpu_custom_call.1
= control target key start
LH: loop header
LB: loop body
LE: loop exit
PB: predicated region body
PF: predicated region fallthrough
CT: control target
= control target key end

     0   :  { %vm35_vm0 = vcmask 64512   ;;  %s917_s0 = inlined_call_operand.vmem [shape: f32[128,8], index: 0, kind: input, shape index: {}]   ;;  %s918_s1 = inlined_call_operand.vmem [shape: f32[8,128], index: 1, kind: input, shape index: {}]   ;;  %s919_s2 = inlined_call_operand.vmem [shape: f32[2,128], index: 2, kind: input, shape index: {}]   ;;  %s920_s3 = inlined_call_operand.hbm [shape: bf16[128,128], index: 3, kind: output, shape index: {0}]   ;;  %s921_s4 = inlined_call_operand.vmem [shape: f32[128,1], index: 4, kind: output, shape index: {1}]   ;;  %s922_s5 = inlined_call_operand.vmem [shape: f32[128,1], index: 5, kind: output, shape index: {2}]  }
   0x1   :  { %v34_v0 = vld [vmem:[%s918_s1] sm:$0xff]  ;;  %v19_v3 = vld [vmem:[%s917_s0 + $0x8] sm:$0xff]  ;;  %v20_v5 = vld [vmem:[%s917_s0 + $0x10] sm:$0xff] }
   0x2   :  { %v18_v1 = vld [vmem:[%s917_s0] sm:$0xff]  ;;  %583 = vmatprep.subr.mxu0 %v34_v0  ;;  %609 = vmatprep.subr.mxu1 %v34_v0  ;;  %v27_v4 = vld [vmem:[%s917_s0 + $0x48] sm:$0xff]  ;;  %v28_v6 = vld [vmem:[%s917_s0 + $0x50] sm:$0xff] }
   0x3   :  { %v26_v2 = vld [vmem:[%s917_s0 + $0x40] sm:$0xff]  ;;  %584 = vmatpush3.msra.mxu0 %v34_v0  ;;  %610 = vmatpush3.msra.mxu1 %v34_v0  ;;  %v21_v7 = vld [vmem:[%s917_s0 + $0x18] sm:$0xff] }
   0x4   :  { %585 = vmatprep.mubr.msk.f32.mxu0 %vm35_vm0, %v18_v1  ;;  %597 = vmatprep.mubr.msk.f32.mxu1 %vm35_vm0, %v26_v2  ;;  %v29_v8 = vld [vmem:[%s917_s0 + $0x58] sm:$0xff] }
   0x5   :  { %586 = vmatmul.mubr.msk.f32.vlgmr.msra.gmra.mrb[0].mxu0 %vm35_vm0, %v19_v3  ;;  %598 = vmatmul.mubr.msk.f32.vlgmr.msra.gmra.mrb[0].mxu1 %vm35_vm0, %v27_v4 }
   0x6   :  { %588 = vmatprep.mubr.msk.f32.mxu0 %vm35_vm0, %v20_v5  ;;  %600 = vmatprep.mubr.msk.f32.mxu1 %vm35_vm0, %v28_v6 }
   0x7   :  { %11 = vsyncpa [#allocation3], 0  ;;  %v22_v9 = vld [vmem:[%s917_s0 + $0x20] sm:$0xff]  ;;  %v23_v11 = vld [vmem:[%s917_s0 + $0x28] sm:$0xff]  ;;  %v230_v17 = vlaneseq }
   0x8   :  { %v30_v10 = vld [vmem:[%s917_s0 + $0x60] sm:$0xff]  ;;  %v31_v12 = vld [vmem:[%s917_s0 + $0x68] sm:$0xff]  ;;  %v24_v13 = vld [vmem:[%s917_s0 + $0x30] sm:$0xff] }
   0x9   :  { %589 = vmatmul.mubr.msk.f32.gmra.mrb[2].mxu0 %vm35_vm0, %v21_v7  ;;  %601 = vmatmul.mubr.msk.f32.gmra.mrb[2].mxu1 %vm35_vm0, %v29_v8  ;;  %v32_v14 = vld [vmem:[%s917_s0 + $0x70] sm:$0xff]  ;;  %v25_v15 = vld [vmem:[%s917_s0 + $0x38] sm:$0xff]  ;;  %v231_v18 = vshrl.u32 %v230_v17, 7  ;;  %v229_v20 = vld [vmem:[%s919_s2] sm:$0x3] }
   0xa   :  { %591 = vmatprep.mubr.msk.f32.mxu0 %vm35_vm0, %v22_v9  ;;  %603 = vmatprep.mubr.msk.f32.mxu1 %vm35_vm0, %v30_v10  ;;  %v33_v16 = vld [vmem:[%s917_s0 + $0x78] sm:$0xff]  ;;  %s638_s0 = smov [#allocation2]  }
   0xb   :  { %v232_v19 = vsub.s32 0, %v231_v18  ;;  %v284_v22 = vsub.s32 1, %v231_v18  ;;  %s452_s2 = sshll.u32 %s638_s0, 4  ;;  %s453_s2 = int_to_ptr.vmem [resolvable:$true] %s452_s2 }
   0xc   :  { %s614_s1 = scalar_lea.vmem %s453_s2, 1024  ;;  %p619_p1 = scmp.lt.s32.totalorder %s453_s2, %s453_s2 }
   0xd   :  { %592 = vmatmul.mubr.msk.f32.gmra.mrb[4].mxu0 %vm35_vm0, %v23_v11  ;;  %604 = vmatmul.mubr.msk.f32.gmra.mrb[4].mxu1 %vm35_vm0, %v31_v12  ;;  %v741_v21 = vrot.slane %v229_v20, %v232_v19  ;;  %v745_v29 = vrot.slane %v229_v20, %v284_v22  ;;  %p615_p0 = scmp.ne.s32.totalorder %s453_s2, %s614_s1  ;;  %p620_p2 = scmp.lt.s32.totalorder %s614_s1, %s614_s1 }
   0xe   :  { %594 = vmatprep.mubr.msk.f32.mxu0 %vm35_vm0, %v24_v13  ;;  %606 = vmatprep.mubr.msk.f32.mxu1 %vm35_vm0, %v32_v14 }
   0xf   :  { %p621_p3 = por %p620_p2, %p619_p1 }
  0x11   :  { %595 = vmatmul.mubr.msk.f32.gmra.mrb[6].mxu0 %vm35_vm0, %v25_v15  ;;  %607 = vmatmul.mubr.msk.f32.gmra.mrb[6].mxu1 %vm35_vm0, %v33_v16  ;;  %p622_p4 = pnand %p621_p3, %p615_p0 }
  0xd8   :  { %v587_v23 = vpop.f32.mrb[0].mxu0  ;;  %v599_v24 = vpop.f32.mrb[0].mxu1 }
  0xd9   :  { %v150_v25 = vpop.f32.mrb[1].mxu0  ;;  %v190_v26 = vpop.f32.mrb[1].mxu1  ;;  %v243_v27 = vmul.f32 %v599_v24, %v741_v21  ;;  %v235_v28 = vmul.f32 %v587_v23, %v741_v21  ;;  %v287_v34 = vmul.f32 %v587_v23, %v745_v29  ;;  %v295_v42 = vmul.f32 %v599_v24, %v745_v29 }
  0xda   :  { %v522_v30 = vpack.c.bf16 %v587_v23, %v150_v25  ;;  %v542_v31 = vpack.c.bf16 %v599_v24, %v190_v26  ;;  %v234_v35 = vmul.f32 %v741_v21, %v150_v25  ;;  %v242_v43 = vmul.f32 %v741_v21, %v190_v26 }
  0xdb   :  { %268 = vadd.xlane.f32.xlu1 %v243_v27  ;;  %252 = vadd.xlane.f32.xlu0 %v235_v28  ;;  %v286_v51 = vmul.f32 %v745_v29, %v150_v25  ;;  %v294_v57 = vmul.f32 %v745_v29, %v190_v26 }
  0xdc   :  { %523 = vst [vmem:[#allocation2] sm:$0xff] %v522_v30   ;;  %562 = vst [vmem:[#allocation2 + $0x20] sm:$0xff] %v542_v31   ;;  %v590_v32 = vpop.f32.mrb[2].mxu0  ;;  %v602_v33 = vpop.f32.mrb[2].mxu1 }
  0xdd   :  { %v160_v36 = vpop.f32.mrb[3].mxu0  ;;  %v200_v37 = vpop.f32.mrb[3].mxu1  ;;  %v237_v48 = vmul.f32 %v590_v32, %v741_v21  ;;  %v245_v56 = vmul.f32 %v602_v33, %v741_v21  ;;  %v289_v59 = vmul.f32 %v590_v32, %v745_v29  ;;  %v297_v60 = vmul.f32 %v602_v33, %v745_v29 }
  0xde   :  { %v527_v38 = vpack.c.bf16 %v590_v32, %v160_v36  ;;  %v547_v39 = vpack.c.bf16 %v602_v33, %v200_v37  ;;  %v244_v58 = vmul.f32 %v741_v21, %v200_v37  ;;  %v288_v61 = vmul.f32 %v745_v29, %v160_v36 }
  0xdf   :  { %304 = vadd.xlane.f32.xlu1 %v287_v34  ;;  %250 = vadd.xlane.f32.xlu0 %v234_v35  ;;  %v296_v62 = vmul.f32 %v745_v29, %v200_v37  ;;  %v236_v63 = vmul.f32 %v741_v21, %v160_v36 }
  0xe0   :  { %559 = vst [vmem:[#allocation2 + $0x8] sm:$0xff] %v527_v38   ;;  %563 = vst [vmem:[#allocation2 + $0x28] sm:$0xff] %v547_v39   ;;  %v593_v40 = vpop.f32.mrb[4].mxu0  ;;  %v605_v41 = vpop.f32.mrb[4].mxu1 }
  0xe1   :  { %v170_v44 = vpop.f32.mrb[5].mxu0  ;;  %v210_v45 = vpop.f32.mrb[5].mxu1  ;;  %v239_v0 = vmul.f32 %v593_v40, %v741_v21  ;;  %v247_v2 = vmul.f32 %v605_v41, %v741_v21  ;;  %v291_v4 = vmul.f32 %v593_v40, %v745_v29  ;;  %v299_v6 = vmul.f32 %v605_v41, %v745_v29 }
  0xe2   :  { %v532_v46 = vpack.c.bf16 %v593_v40, %v170_v44  ;;  %v552_v47 = vpack.c.bf16 %v605_v41, %v210_v45  ;;  %v238_v1 = vmul.f32 %v741_v21, %v170_v44  ;;  %v246_v3 = vmul.f32 %v741_v21, %v210_v45 }
  0xe3   :  { %320 = vadd.xlane.f32.xlu1 %v295_v42  ;;  %266 = vadd.xlane.f32.xlu0 %v242_v43  ;;  %v290_v5 = vmul.f32 %v745_v29, %v170_v44  ;;  %v298_v7 = vmul.f32 %v745_v29, %v210_v45 }
  0xe4   :  { %560 = vst [vmem:[#allocation2 + $0x10] sm:$0xff] %v532_v46   ;;  %564 = vst [vmem:[#allocation2 + $0x30] sm:$0xff] %v552_v47   ;;  %v596_v49 = vpop.f32.mrb[6].mxu0  ;;  %v608_v50 = vpop.f32.mrb[6].mxu1 }
  0xe5   :  { %v180_v52 = vpop.f32.mrb[7].mxu0  ;;  %v220_v53 = vpop.f32.mrb[7].mxu1  ;;  %v241_v8 = vmul.f32 %v596_v49, %v741_v21  ;;  %v249_v10 = vmul.f32 %v608_v50, %v741_v21  ;;  %v293_v12 = vmul.f32 %v596_v49, %v745_v29  ;;  %v301_v14 = vmul.f32 %v608_v50, %v745_v29 }
  0xe6   :  { %v537_v54 = vpack.c.bf16 %v596_v49, %v180_v52  ;;  %v557_v55 = vpack.c.bf16 %v608_v50, %v220_v53  ;;  %v240_v9 = vmul.f32 %v741_v21, %v180_v52  ;;  %v248_v11 = vmul.f32 %v741_v21, %v220_v53 }
  0xe7   :  { %302 = vadd.xlane.f32.xlu0 %v286_v51  ;;  %256 = vadd.xlane.f32.xlu1 %v237_v48  ;;  %v292_v13 = vmul.f32 %v745_v29, %v180_v52  ;;  %v300_v15 = vmul.f32 %v745_v29, %v220_v53 }
  0xe8   :  { %561 = vst [vmem:[#allocation2 + $0x18] sm:$0xff] %v537_v54   ;;  %565 = vst [vmem:[#allocation2 + $0x38] sm:$0xff] %v557_v55  }
  0xeb   :  { %318 = vadd.xlane.f32.xlu0 %v294_v57  ;;  %272 = vadd.xlane.f32.xlu1 %v245_v56 }
  0xef   :  { %270 = vadd.xlane.f32.xlu0 %v244_v58  ;;  %308 = vadd.xlane.f32.xlu1 %v289_v59 }
  0xf3   :  { %324 = vadd.xlane.f32.xlu1 %v297_v60  ;;  %306 = vadd.xlane.f32.xlu0 %v288_v61 }
  0xf7   :  { %322 = vadd.xlane.f32.xlu0 %v296_v62  ;;  %254 = vadd.xlane.f32.xlu1 %v236_v63 }
  0xfb   :  { %260 = vadd.xlane.f32.xlu1 %v239_v0  ;;  %258 = vadd.xlane.f32.xlu0 %v238_v1 }
  0xff   :  { %276 = vadd.xlane.f32.xlu1 %v247_v2  ;;  %274 = vadd.xlane.f32.xlu0 %v246_v3 }
 0x103   :  { %312 = vadd.xlane.f32.xlu1 %v291_v4  ;;  %310 = vadd.xlane.f32.xlu0 %v290_v5 }
 0x107   :  { %328 = vadd.xlane.f32.xlu1 %v299_v6  ;;  %326 = vadd.xlane.f32.xlu0 %v298_v7 }
 0x10b   :  { %264 = vadd.xlane.f32.xlu1 %v241_v8  ;;  %262 = vadd.xlane.f32.xlu0 %v240_v9 }
 0x10f   :  { %280 = vadd.xlane.f32.xlu1 %v249_v10  ;;  %278 = vadd.xlane.f32.xlu0 %v248_v11 }
 0x113   :  { %316 = vadd.xlane.f32.xlu1 %v293_v12  ;;  %314 = vadd.xlane.f32.xlu0 %v292_v13 }
 0x117   :  { %332 = vadd.xlane.f32.xlu1 %v301_v14  ;;  %330 = vadd.xlane.f32.xlu0 %v300_v15 }
 0x118   :  { %625 = shalt.err (!%p622_p4)
}
 0x119   :  { %s626_s30 = scalar_lea.hbm %s920_s3, 1024 }
 0x11a   :  { %p627_p5 = scmp.ne.s32.totalorder %s920_s3, %s626_s30  ;;  %p630_p6 = scmp.lt.u32.totalorder %s626_s30, %s920_s3 }
 0x11c   :  { %p632_p7 = pnand %p630_p6, %p627_p5 }
 0x11e   :  { %635 = shalt.err (!%p632_p7)
}
 0x11f   :  { %s639_s10 = smov 64   ;;  %s640_s11 = smov 4   ;;  %vm414_vm1 = vcmask 7168  }
 0x120   :  { %458 = dma.vmem_to_hbm [thread:$0]  %s453_s2, 1024, %s920_s3, [#allocation3], %s639_s10, %s639_s10, %s640_s11  }
 0x168   :  { %v269_v16 = vpop.xlane.xlu1 %268  ;;  %v253_v17 = vpop.xlane.xlu0 %252 }
 0x169   :  { %424 = vst.msk [vmem:[%s921_s4 + $0x48] sm:$0xff] %vm414_vm1, %v269_v16  ;;  %416 = vst.msk [vmem:[%s921_s4 + $0x8] sm:$0xff] %vm414_vm1, %v253_v17 }
 0x16c   :  { %v305_v18 = vpop.xlane.xlu1 %304  ;;  %v251_v19 = vpop.xlane.xlu0 %250 }
 0x16d   :  { %432 = vst.msk [vmem:[%s922_s5 + $0x8] sm:$0xff] %vm414_vm1, %v305_v18  ;;  %415 = vst.msk [vmem:[%s921_s4] sm:$0xff] %vm414_vm1, %v251_v19 }
 0x170   :  { %v321_v20 = vpop.xlane.xlu1 %320  ;;  %v267_v21 = vpop.xlane.xlu0 %266 }
 0x171   :  { %440 = vst.msk [vmem:[%s922_s5 + $0x48] sm:$0xff] %vm414_vm1, %v321_v20  ;;  %423 = vst.msk [vmem:[%s921_s4 + $0x40] sm:$0xff] %vm414_vm1, %v267_v21 }
 0x174   :  { %v303_v22 = vpop.xlane.xlu0 %302  ;;  %v257_v23 = vpop.xlane.xlu1 %256 }
 0x175   :  { %431 = vst.msk [vmem:[%s922_s5] sm:$0xff] %vm414_vm1, %v303_v22  ;;  %418 = vst.msk [vmem:[%s921_s4 + $0x18] sm:$0xff] %vm414_vm1, %v257_v23 }
 0x178   :  { %v319_v24 = vpop.xlane.xlu0 %318  ;;  %v273_v25 = vpop.xlane.xlu1 %272 }
 0x179   :  { %439 = vst.msk [vmem:[%s922_s5 + $0x40] sm:$0xff] %vm414_vm1, %v319_v24  ;;  %426 = vst.msk [vmem:[%s921_s4 + $0x58] sm:$0xff] %vm414_vm1, %v273_v25 }
 0x17c   :  { %v271_v26 = vpop.xlane.xlu0 %270  ;;  %v309_v27 = vpop.xlane.xlu1 %308 }
 0x17d   :  { %425 = vst.msk [vmem:[%s921_s4 + $0x50] sm:$0xff] %vm414_vm1, %v271_v26  ;;  %434 = vst.msk [vmem:[%s922_s5 + $0x18] sm:$0xff] %vm414_vm1, %v309_v27 }
 0x180   :  { %v325_v28 = vpop.xlane.xlu1 %324  ;;  %v307_v29 = vpop.xlane.xlu0 %306 }
 0x181   :  { %442 = vst.msk [vmem:[%s922_s5 + $0x58] sm:$0xff] %vm414_vm1, %v325_v28  ;;  %433 = vst.msk [vmem:[%s922_s5 + $0x10] sm:$0xff] %vm414_vm1, %v307_v29 }
 0x184   :  { %v323_v30 = vpop.xlane.xlu0 %322  ;;  %v255_v31 = vpop.xlane.xlu1 %254 }
 0x185   :  { %441 = vst.msk [vmem:[%s922_s5 + $0x50] sm:$0xff] %vm414_vm1, %v323_v30  ;;  %417 = vst.msk [vmem:[%s921_s4 + $0x10] sm:$0xff] %vm414_vm1, %v255_v31 }
 0x188   :  { %v261_v32 = vpop.xlane.xlu1 %260  ;;  %v259_v33 = vpop.xlane.xlu0 %258 }
 0x189   :  { %420 = vst.msk [vmem:[%s921_s4 + $0x28] sm:$0xff] %vm414_vm1, %v261_v32  ;;  %419 = vst.msk [vmem:[%s921_s4 + $0x20] sm:$0xff] %vm414_vm1, %v259_v33 }
 0x18c   :  { %v277_v34 = vpop.xlane.xlu1 %276  ;;  %v275_v35 = vpop.xlane.xlu0 %274 }
 0x18d   :  { %428 = vst.msk [vmem:[%s921_s4 + $0x68] sm:$0xff] %vm414_vm1, %v277_v34  ;;  %427 = vst.msk [vmem:[%s921_s4 + $0x60] sm:$0xff] %vm414_vm1, %v275_v35 }
 0x190   :  { %v313_v36 = vpop.xlane.xlu1 %312  ;;  %v311_v37 = vpop.xlane.xlu0 %310 }
 0x191   :  { %436 = vst.msk [vmem:[%s922_s5 + $0x28] sm:$0xff] %vm414_vm1, %v313_v36  ;;  %435 = vst.msk [vmem:[%s922_s5 + $0x20] sm:$0xff] %vm414_vm1, %v311_v37 }
 0x194   :  { %v329_v38 = vpop.xlane.xlu1 %328  ;;  %v327_v39 = vpop.xlane.xlu0 %326 }
 0x195   :  { %444 = vst.msk [vmem:[%s922_s5 + $0x68] sm:$0xff] %vm414_vm1, %v329_v38  ;;  %443 = vst.msk [vmem:[%s922_s5 + $0x60] sm:$0xff] %vm414_vm1, %v327_v39 }
 0x198   :  { %v265_v40 = vpop.xlane.xlu1 %264  ;;  %v263_v41 = vpop.xlane.xlu0 %262 }
 0x199   :  { %422 = vst.msk [vmem:[%s921_s4 + $0x38] sm:$0xff] %vm414_vm1, %v265_v40  ;;  %421 = vst.msk [vmem:[%s921_s4 + $0x30] sm:$0xff] %vm414_vm1, %v263_v41 }
 0x19c   :  { %v281_v42 = vpop.xlane.xlu1 %280  ;;  %v279_v43 = vpop.xlane.xlu0 %278 }
 0x19d   :  { %430 = vst.msk [vmem:[%s921_s4 + $0x78] sm:$0xff] %vm414_vm1, %v281_v42  ;;  %429 = vst.msk [vmem:[%s921_s4 + $0x70] sm:$0xff] %vm414_vm1, %v279_v43 }
 0x1a0   :  { %v317_v44 = vpop.xlane.xlu1 %316  ;;  %v315_v45 = vpop.xlane.xlu0 %314 }
 0x1a1   :  { %438 = vst.msk [vmem:[%s922_s5 + $0x38] sm:$0xff] %vm414_vm1, %v317_v44  ;;  %437 = vst.msk [vmem:[%s922_s5 + $0x30] sm:$0xff] %vm414_vm1, %v315_v45 }
 0x1a4   :  { %v333_v46 = vpop.xlane.xlu1 %332  ;;  %v331_v47 = vpop.xlane.xlu0 %330 }
 0x1a5   :  { %446 = vst.msk [vmem:[%s922_s5 + $0x78] sm:$0xff] %vm414_vm1, %v333_v46  ;;  %445 = vst.msk [vmem:[%s922_s5 + $0x70] sm:$0xff] %vm414_vm1, %v331_v47 }
 0x1a6   :  { %636 = dma.done.wait [#allocation3], 1024  }
 0x1a7   :  { %637 = vsyncadd [#allocation3], 4294966272 }
 0x1a8   :  { %470 = vsyncpa [#allocation3], 1 }

</bundles_post_ra>
